<compile_context>
chip_gen: v7x
topology: tpu7x:2x2x1
jax: 0.10.0
libtpu: 0.0.40
codegen_flags: <defaults>
</compile_context>

<pallas_src>
import functools

import jax
import jax.numpy as jnp
from jax.experimental import pallas as pl
from jax.experimental.pallas import tpu as pltpu


def _cdiv(a: int, b: int) -> int:
    return (a + b - 1) // b


def _round_up(x: int, m: int) -> int:
    return _cdiv(x, m) * m


# --------------------------------------------------------------------------- #
# Tile selection
# --------------------------------------------------------------------------- #
def _choose_nk_tiles(n_in: int, n_out: int, compute_dtype) -> tuple[int, int, int, int]:
    itemsize = jnp.dtype(compute_dtype).itemsize

    # N tile: lane-dense output (multiple of 128); 256-aligned / capped at 512
    # for the 2x256^2 MXU on v6e/v7x.  For mid-size n_out keep tn=256 so the
    # grid has >=2 parallel programs even when the whole batch is one M tile
    # (keeps both v7x TensorCores busy).
    if n_out <= 256:
        tn = _round_up(max(n_out, 1), 128)
    elif n_out <= 1024:
        tn = 256
    else:
        tn = 512
    n_p = _round_up(n_out, tn)

    # K tile: large (1024 f32 / 2048 bf16) so each grid step does plenty of MXU
    # work; ceil-split so K zero-padding stays minimal.
    tk_max = 2048 if itemsize <= 2 else 1024
    align_k = 128 if n_in <= 256 else 256
    k_tiles = _cdiv(max(n_in, 1), tk_max)
    tk = _round_up(_cdiv(n_in, k_tiles), align_k)
    k_p = k_tiles * tk
    return tn, tk, n_p, k_p


def _choose_m_tile(batch: int, compute_dtype) -> tuple[int, int]:
    itemsize = jnp.dtype(compute_dtype).itemsize
    sub = {1: 32, 2: 16}.get(itemsize, 8)   # bf16 packs 16 rows / sublane group
    tm_max = 512
    m_tiles = _cdiv(max(batch, 1), tm_max)
    # Ceil-split the batch across M tiles -> at most (sub-1) dead rows per tile
    # instead of up to tm-1; for batch <= 512 the whole batch is a single tile,
    # so the weight panel is streamed from HBM exactly once.
    tm = _round_up(_cdiv(batch, m_tiles), sub)
    return tm, m_tiles * tm


# --------------------------------------------------------------------------- #
# Kernel
# --------------------------------------------------------------------------- #
def _linear_kernel(x_ref, w_ref, b_ref, o_ref, acc_ref):
    # x_ref:   [tm, tk]  activations tile (compute dtype)
    # w_ref:   [tk, tn]  weight tile, already transposed to [n_in, n_out]
    # b_ref:   [1,  tn]  bias tile (f32)
    # o_ref:   [tm, tn]  output tile
    # acc_ref: [tm, tn]  f32 scratch, resident across the K grid axis
    k = pl.program_id(2)

    @pl.when(k == 0)
    def _():
        acc_ref[...] = jnp.zeros_like(acc_ref)

    # Canonical [tm,tk] @ [tk,tn] MXU contraction, f32 accumulation.
    acc_ref[...] += jnp.dot(x_ref[...], w_ref[...],
                            preferred_element_type=jnp.float32)

    @pl.when(k == pl.num_programs(2) - 1)
    def _():
        o_ref[...] = (acc_ref[...] + b_ref[...]).astype(o_ref.dtype)


# --------------------------------------------------------------------------- #
# Per-call path (only x is padded/cast here; W/b were prepared at init)
# --------------------------------------------------------------------------- #
@functools.partial(jax.jit, static_argnames=("n_out", "tm", "tn", "tk", "m_p"))
def _linear_pallas_call(x, w_t_p, b_p, *, n_out, tm, tn, tk, m_p):
    B, n_in = x.shape
    k_p, n_p = w_t_p.shape
    out_dtype = x.dtype

    x = x.astype(w_t_p.dtype)
    x_p = jnp.pad(x, ((0, m_p - B), (0, k_p - n_in)))

    grid = (m_p // tm, n_p // tn, k_p // tk)

    c_it = w_t_p.dtype.itemsize
    o_it = jnp.dtype(out_dtype).itemsize
    vmem_needed = (2 * tm * tk * c_it      # x: double-buffered input tile
                   + 2 * tk * tn * c_it    # w: double-buffered input tile
                   + 2 * tm * tn * o_it    # out: double-buffered output tile
                   + tm * tn * 4           # f32 accumulator scratch
                   + 2 * tn * 4)           # bias tile
    # Cap at 48 MiB: safe on v7x's 64 MiB/TC, ample headroom on v5e/v6e (128 MiB).
    vmem_limit = int(min(max(2 * vmem_needed, 32 * 1024 * 1024), 48 * 1024 * 1024))

    cost = pl.CostEstimate(
        flops=2 * m_p * k_p * n_p,
        transcendentals=0,
        bytes_accessed=(m_p * k_p * c_it + k_p * n_p * c_it + m_p * n_p * o_it),
    )

    y_p = pl.pallas_call(
        _linear_kernel,
        out_shape=jax.ShapeDtypeStruct((m_p, n_p), out_dtype),
        grid=grid,
        in_specs=[
            pl.BlockSpec((tm, tk), lambda i, j, k: (i, k)),   # x
            pl.BlockSpec((tk, tn), lambda i, j, k: (k, j)),   # W^T (pre-transposed)
            pl.BlockSpec((1, tn), lambda i, j, k: (0, j)),    # bias
        ],
        out_specs=pl.BlockSpec((tm, tn), lambda i, j, k: (i, j)),
        scratch_shapes=[pltpu.VMEM((tm, tn), jnp.float32)],
        compiler_params=pltpu.CompilerParams(
            dimension_semantics=("parallel", "parallel", "arbitrary"),
            vmem_limit_bytes=vmem_limit,
        ),
        cost_estimate=cost,
    )(x_p, w_t_p, b_p)

    return y_p[:B, :n_out]


# --------------------------------------------------------------------------- #
# Module wrapper (== TestModule: forward(inp) = Linear(n_in, n_out)(inp))
# --------------------------------------------------------------------------- #
class PallasLinear:
    """y = x @ weight.T + bias, same semantics as torch.nn.Linear.

    Weight is cast / transposed / padded exactly once at construction time,
    so the per-call hot path only pads the activations.
    """

    def __init__(self, weight, bias, *, compute_dtype=None):
        weight = jnp.asarray(weight)
        bias = jnp.asarray(bias)
        n_out, n_in = weight.shape
        assert bias.shape == (n_out,)
        self.n_in, self.n_out = n_in, n_out
        self.compute_dtype = jnp.dtype(compute_dtype or weight.dtype)

        self.tn, self.tk, n_p, k_p = _choose_nk_tiles(n_in, n_out, self.compute_dtype)

        # One-time weight prep: cast -> transpose to [n_in, n_out] (canonical
        # [tm,tk]@[tk,tn] contraction, lane-dense in N) -> zero-pad (K padding
        # keeps the accumulation exact).
        w_t = weight.astype(self.compute_dtype).T
        self.w_t_p = jnp.pad(w_t, ((0, k_p - n_in), (0, n_p - n_out)))
        self.b_p = jnp.pad(bias.astype(jnp.float32), (0, n_p - n_out)).reshape(1, n_p)

    def __call__(self, x):
        lead = x.shape[:-1]
        x2 = x.reshape(-1, x.shape[-1])
        assert x2.shape[-1] == self.n_in
        tm, m_p = _choose_m_tile(x2.shape[0], self.compute_dtype)
        y = _linear_pallas_call(x2, self.w_t_p, self.b_p,
                                n_out=self.n_out, tm=tm, tn=self.tn,
                                tk=self.tk, m_p=m_p)
        return y.reshape(*lead, self.n_out)


if __name__ == "__main__":
    # TestModule(n_in, n_out) == nn.Linear(n_in, n_out); forward(inp) = mlp(inp)
    n_in, n_out, batch = 32, 16, 8

    key = jax.random.PRNGKey(0)
    kx, kw, kb = jax.random.split(key, 3)

    # Deterministic init mimicking PyTorch's Linear default:
    # uniform(-1/sqrt(n_in), 1/sqrt(n_in)) for both weight and bias.
    bound = 1.0 / float(jnp.sqrt(jnp.float32(n_in)))
    weight = jax.random.uniform(kw, (n_out, n_in), jnp.float32, -bound, bound)
    bias = jax.random.uniform(kb, (n_out,), jnp.float32, -bound, bound)
    x = jax.random.normal(kx, (batch, n_in), jnp.float32)

    y_ref = x @ weight.T + bias

    # f32 path (bit-accurate vs. the torch/f32 reference).
    lin = PallasLinear(weight, bias)
    y = lin(x)
    jax.block_until_ready(y)
    assert y.shape == (batch, n_out)
    assert jnp.allclose(y, y_ref, atol=1e-5, rtol=1e-5)

    # bf16-operand path (recommended default on v6e/v7x); accumulation is f32
    # in-kernel, so only operand-rounding error remains -> loose tolerance.
    lin_bf16 = PallasLinear(weight, bias, compute_dtype=jnp.bfloat16)
    y_bf = lin_bf16(x)
    jax.block_until_ready(y_bf)
    assert jnp.allclose(y_bf, y_ref, atol=3e-2, rtol=3e-2)

    print("KERNEL_OK")
</pallas_src>

<mosaic_0001>
module attributes {stable_mosaic.version = 11 : i64} {
  func.func @_linear_kernel(%arg0: i32, %arg1: i32, %arg2: i32, %arg3: memref<8x128xf32, #tpu.memory_space<vmem>>, %arg4: memref<128x128xf32, #tpu.memory_space<vmem>>, %arg5: memref<1x128xf32, #tpu.memory_space<vmem>>, %arg6: memref<8x128xf32, #tpu.memory_space<vmem>>, %arg7: memref<8x128xf32, #tpu.memory_space<vmem>>) attributes {dimension_semantics = [#tpu.dimension_semantics<parallel>, #tpu.dimension_semantics<parallel>, #tpu.dimension_semantics<arbitrary>], iteration_bounds = array<i64: 1, 1, 1>, scalar_prefetch = 0 : i64, scratch_operands = 1 : i64, tpu.core_type = #tpu.core_type<tc>, window_params = [{transform_indices = @transform_0, window_bounds = array<i64: 8, 128>}, {transform_indices = @transform_1, window_bounds = array<i64: 128, 128>}, {transform_indices = @transform_2, window_bounds = array<i64: 1, 128>}, {transform_indices = @transform_3, window_bounds = array<i64: 8, 128>}]} {
    %c0_i32 = arith.constant 0 : i32
    %0 = arith.cmpi eq, %arg2, %c0_i32 : i32
    %1 = arith.extui %0 : i1 to i32
    %c0_i32_0 = arith.constant 0 : i32
    %2 = arith.cmpi ne, %1, %c0_i32_0 : i32
    scf.if %2 {
      %cst_10 = arith.constant 0.000000e+00 : f32
      %12 = vector.broadcast %cst_10 : f32 to vector<8x128xf32>
      %c0_11 = arith.constant 0 : index
      %c0_12 = arith.constant 0 : index
      %13 = vector.load %arg7[%c0_11, %c0_12] : memref<8x128xf32, #tpu.memory_space<vmem>>, vector<8x128xf32>
      tpu.vector_store %arg7[%c0_11, %c0_12], %12 {strides = array<i32>} : memref<8x128xf32, #tpu.memory_space<vmem>>, vector<8x128xf32>,
    } else {
    }
    %c0 = arith.constant 0 : index
    %c0_1 = arith.constant 0 : index
    %3 = vector.load %arg7[%c0, %c0_1] : memref<8x128xf32, #tpu.memory_space<vmem>>, vector<8x128xf32>
    %c0_2 = arith.constant 0 : index
    %c0_3 = arith.constant 0 : index
    %4 = vector.load %arg3[%c0_2, %c0_3] : memref<8x128xf32, #tpu.memory_space<vmem>>, vector<8x128xf32>
    %c0_4 = arith.constant 0 : index
    %c0_5 = arith.constant 0 : index
    %5 = vector.load %arg4[%c0_4, %c0_5] : memref<128x128xf32, #tpu.memory_space<vmem>>, vector<128x128xf32>
    %cst = arith.constant dense<0.000000e+00> : vector<8x128xf32>
    %6 = tpu.matmul %4, %5, %cst {dimension_numbers = #tpu.dot_dimension_numbers<[1], [0], [0], [1], [0, 0, 1, 1], [], []>} : vector<8x128xf32>, vector<128x128xf32>, vector<8x128xf32> -> vector<8x128xf32>
    %7 = arith.addf %3, %6 : vector<8x128xf32>
    %c0_6 = arith.constant 0 : index
    %c0_7 = arith.constant 0 : index
    %8 = vector.load %arg7[%c0_6, %c0_7] : memref<8x128xf32, #tpu.memory_space<vmem>>, vector<8x128xf32>
    tpu.vector_store %arg7[%c0_6, %c0_7], %7 {strides = array<i32>} : memref<8x128xf32, #tpu.memory_space<vmem>>, vector<8x128xf32>,
    %c0_i32_8 = arith.constant 0 : i32
    %9 = arith.cmpi eq, %arg2, %c0_i32_8 : i32
    %10 = arith.extui %9 : i1 to i32
    %c0_i32_9 = arith.constant 0 : i32
    %11 = arith.cmpi ne, %10, %c0_i32_9 : i32
    scf.if %11 {
      %c0_10 = arith.constant 0 : index
      %c0_11 = arith.constant 0 : index
      %12 = vector.load %arg7[%c0_10, %c0_11] : memref<8x128xf32, #tpu.memory_space<vmem>>, vector<8x128xf32>
      %c0_12 = arith.constant 0 : index
      %c0_13 = arith.constant 0 : index
      %13 = vector.load %arg5[%c0_12, %c0_13] : memref<1x128xf32, #tpu.memory_space<vmem>>, vector<1x128xf32>
      %14 = vector.broadcast %13 : vector<1x128xf32> to vector<8x128xf32>
      %15 = arith.addf %12, %14 : vector<8x128xf32>
      %c0_14 = arith.constant 0 : index
      %c0_15 = arith.constant 0 : index
      %16 = vector.load %arg6[%c0_14, %c0_15] : memref<8x128xf32, #tpu.memory_space<vmem>>, vector<8x128xf32>
      tpu.vector_store %arg6[%c0_14, %c0_15], %15 {strides = array<i32>} : memref<8x128xf32, #tpu.memory_space<vmem>>, vector<8x128xf32>,
    } else {
    }
    return
  }
  func.func @transform_0(%arg0: i32, %arg1: i32, %arg2: i32) -> (i32, i32) {
    %c0_i32 = arith.constant 0 : i32
    return %arg0, %arg2 : i32, i32
  }
  func.func @transform_1(%arg0: i32, %arg1: i32, %arg2: i32) -> (i32, i32) {
    %c0_i32 = arith.constant 0 : i32
    return %arg2, %arg1 : i32, i32
  }
  func.func @transform_2(%arg0: i32, %arg1: i32, %arg2: i32) -> (i32, i32) {
    %c0_i32 = arith.constant 0 : i32
    %c0_i32_0 = arith.constant 0 : i32
    return %c0_i32, %arg1 : i32, i32
  }
  func.func @transform_3(%arg0: i32, %arg1: i32, %arg2: i32) -> (i32, i32) {
    %c0_i32 = arith.constant 0 : i32
    return %arg0, %arg1 : i32, i32
  }
}

</mosaic_0001>

<bundles_post_ra>
// kernel: _linear_pallas_call.1
= control target key start
LH: loop header
LB: loop body
LE: loop exit
PB: predicated region body
PF: predicated region fallthrough
CT: control target
= control target key end

     0   :  { %8 = vsyncpa [#allocation4], 0  ;;  %s341_s0 = inlined_call_operand.vmem [shape: f32[8,128], index: 0, kind: input, shape index: {}]   ;;  %s342_s1 = inlined_call_operand.hbm [shape: f32[128,128], index: 1, kind: input, shape index: {}]   ;;  %s343_s2 = inlined_call_operand.vmem [shape: f32[1,128], index: 2, kind: input, shape index: {}]   ;;  %s344_s3 = inlined_call_operand.hbm [shape: f32[8,128], index: 3, kind: output, shape index: {}]  }
   0x1   :  { %9 = vsyncpa [#allocation5], 0  ;;  %s284_s12 = smov [#allocation3]   ;;  %s236_s16 = scalar_lea.hbm %s342_s1, 2048 }
   0x2   :  { %s17_s13 = sshll.u32 %s284_s12, 4  ;;  %p237_p0 = scmp.ne.s32.totalorder %s342_s1, %s236_s16  ;;  %s18_s13 = int_to_ptr.vmem [resolvable:$true] %s17_s13 }
   0x3   :  { %p240_p1 = scmp.lt.u32.totalorder %s236_s16, %s342_s1 }
   0x5   :  { %p242_p2 = pnand %p240_p1, %p237_p0 }
   0x7   :  { %245 = shalt.err (!%p242_p2)
}
   0x8   :  { %s246_s21 = scalar_lea.vmem %s18_s13, 2048  ;;  %p251_p4 = scmp.lt.s32.totalorder %s18_s13, %s18_s13 }
   0x9   :  { %p247_p3 = scmp.ne.s32.totalorder %s18_s13, %s246_s21  ;;  %p252_p5 = scmp.lt.s32.totalorder %s246_s21, %s246_s21 }
   0xb   :  { %p253_p6 = por %p252_p5, %p251_p4 }
   0xd   :  { %p254_p7 = pnand %p253_p6, %p247_p3 }
   0xf   :  { %257 = shalt.err (!%p254_p7)
}
  0x10   :  { %s285_s22 = smov 128   ;;  %s286_s23 = smov 8  }
  0x11   :  { %23 = dma.hbm_to_vmem [thread:$0]  %s342_s1, 2048, %s18_s13, [#allocation4], %s285_s22, %s285_s22, %s286_s23  }
  0x12   :  { %280 = dma.done.wait [#allocation4], 2048  }
  0x13   :  { %281 = vsyncadd [#allocation4], 4294965248  ;;  %v287_v0 = vmov 0.0|0.0   ;;  %vm288_vm0 = vmmov 0   ;;  %v289_v1 = vmov 0.0   ;;  %v36_v2 = vld [vmem:[#allocation3] sm:$0xff] }
  0x14   :  { %205 = vmatprep.subr.bf16.mxu0 %v287_v0  ;;  %202 = vmatprep.mubr.msk.f32.mxu0 %vm288_vm0, %v289_v1  ;;  %v37_v3 = vld [vmem:[#allocation3 + $0x8] sm:$0xff]  ;;  %v38_v4 = vld [vmem:[#allocation3 + $0x10] sm:$0xff]  ;;  %v39_v6 = vld [vmem:[#allocation3 + $0x18] sm:$0xff]  ;;  %s290_s29 = smov [#allocation6]  }
  0x15   :  { %v206_v5 = vpack.c.bf16 %v37_v3, %v36_v2  ;;  %v209_v7 = vpack.c.bf16 %v39_v6, %v38_v4  ;;  %v40_v8 = vld [vmem:[#allocation3 + $0x20] sm:$0xff]  ;;  %v41_v9 = vld [vmem:[#allocation3 + $0x28] sm:$0xff]  ;;  %v42_v11 = vld [vmem:[#allocation3 + $0x30] sm:$0xff]  ;;  %s143_s30 = sshll.u32 %s290_s29, 4  ;;  %s144_s30 = int_to_ptr.vmem [resolvable:$true] %s143_s30 }
  0x16   :  { %v212_v10 = vpack.c.bf16 %v41_v9, %v40_v8  ;;  %v43_v12 = vld [vmem:[#allocation3 + $0x38] sm:$0xff]  ;;  %v44_v14 = vld [vmem:[#allocation3 + $0x40] sm:$0xff]  ;;  %v45_v15 = vld [vmem:[#allocation3 + $0x48] sm:$0xff]  ;;  %s258_s4 = scalar_lea.vmem %s144_s30, 128  ;;  %p263_p9 = scmp.lt.s32.totalorder %s144_s30, %s144_s30 }
  0x17   :  { %207 = vmatpush3.bf16.msra.mxu0 %v206_v5  ;;  %v215_v13 = vpack.c.bf16 %v43_v12, %v42_v11  ;;  %v218_v16 = vpack.c.bf16 %v45_v15, %v44_v14  ;;  %v46_v17 = vld [vmem:[#allocation3 + $0x50] sm:$0xff]  ;;  %v47_v18 = vld [vmem:[#allocation3 + $0x58] sm:$0xff]  ;;  %v48_v20 = vld [vmem:[#allocation3 + $0x60] sm:$0xff]  ;;  %p259_p8 = scmp.ne.s32.totalorder %s144_s30, %s258_s4  ;;  %p264_p10 = scmp.lt.s32.totalorder %s258_s4, %s258_s4 }
  0x18   :  { %208 = vmatprep.subr.bf16.mxu0 %v287_v0  ;;  %v221_v19 = vpack.c.bf16 %v47_v18, %v46_v17  ;;  %v49_v21 = vld [vmem:[#allocation3 + $0x68] sm:$0xff]  ;;  %v50_v23 = vld [vmem:[#allocation3 + $0x70] sm:$0xff]  ;;  %v51_v24 = vld [vmem:[#allocation3 + $0x78] sm:$0xff] }
  0x19   :  { %v224_v22 = vpack.c.bf16 %v49_v21, %v48_v20  ;;  %v227_v25 = vpack.c.bf16 %v51_v24, %v50_v23  ;;  %v35_v26 = vld [vmem:[%s341_s0] sm:$0xff]  ;;  %p265_p11 = por %p264_p10, %p263_p9 }
  0x1a   :  { %v152_v27 = vld [vmem:[%s343_s2] ss:$0 sm:$0xff] }
  0x1b   :  { %210 = vmatpush3.bf16.msra.mxu0 %v209_v7  ;;  %p266_p12 = pnand %p265_p11, %p259_p8 }
  0x1c   :  { %211 = vmatprep.subr.bf16.mxu0 %v287_v0 }
  0x1f   :  { %213 = vmatpush3.bf16.msra.mxu0 %v212_v10 }
  0x20   :  { %214 = vmatprep.subr.bf16.mxu0 %v287_v0 }
  0x23   :  { %216 = vmatpush3.bf16.msra.mxu0 %v215_v13 }
  0x24   :  { %217 = vmatprep.subr.bf16.mxu0 %v287_v0 }
  0x27   :  { %219 = vmatpush3.bf16.msra.mxu0 %v218_v16 }
  0x28   :  { %220 = vmatprep.subr.bf16.mxu0 %v287_v0 }
  0x2b   :  { %222 = vmatpush3.bf16.msra.mxu0 %v221_v19 }
  0x2c   :  { %223 = vmatprep.subr.bf16.mxu0 %v287_v0 }
  0x2f   :  { %225 = vmatpush3.bf16.msra.mxu0 %v224_v22 }
  0x30   :  { %226 = vmatprep.subr.bf16.mxu0 %v287_v0 }
  0x33   :  { %228 = vmatpush3.bf16.msra.mxu0 %v227_v25 }
  0x36   :  { %203 = vmatmul.mubr.f32.vlgmr.msra.gmra.mrb[0].mxu0 %v35_v26 }
 0x109   :  { %v118_v28 = vpop.f32.mrb[0].mxu0 }
 0x10a   :  { %v135_v29 = vadd.f32 %v152_v27, %v118_v28  ;;  %v204_v30 = vpop.f32.mrb[1].mxu0 }
 0x10c   :  { %136 = vst [vmem:[#allocation6] sm:$0xff] %v135_v29 }
 0x10d   :  { %269 = shalt.err (!%p266_p12)
}
 0x10e   :  { %s270_s6 = scalar_lea.hbm %s344_s3, 128 }
 0x10f   :  { %p271_p13 = scmp.ne.s32.totalorder %s344_s3, %s270_s6  ;;  %p274_p0 = scmp.lt.u32.totalorder %s270_s6, %s344_s3 }
 0x111   :  { %p276_p1 = pnand %p274_p0, %p271_p13 }
 0x113   :  { %279 = shalt.err (!%p276_p1)
}
 0x114   :  { %146 = dma.vmem_to_hbm [thread:$0]  %s144_s30, 128, %s344_s3, [#allocation5]  }
 0x115   :  { %282 = dma.done.wait [#allocation5], 128  }
 0x116   :  { %283 = vsyncadd [#allocation5], 4294967168 }
 0x117   :  { %150 = vsyncpa [#allocation4], 1 }
 0x118   :  { %151 = vsyncpa [#allocation5], 1 }

</bundles_post_ra>
